<compile_context>
chip_gen: v7x
topology: tpu7x:2x2x1
jax: 0.10.0
libtpu: 0.0.40
codegen_flags: <defaults>
</compile_context>

<pallas_src>
import functools

import jax
import jax.numpy as jnp
from jax.experimental import pallas as pl
from jax.experimental.pallas import tpu as pltpu

_HEAD_PAD = 128  # per-head lane padding -> per-head slices land on 128-lane boundaries


def _transformer_kernel(cq_ref, sq_ref, wtab_ref, itab_ref, wqkv_ref, uinit_ref,
                        hist_ref, iqt_ref, last_ref, *, n_heads):
    f32 = jnp.float32
    L = cq_ref.shape[0]
    E = wtab_ref.shape[1]
    W = wtab_ref.shape[0]
    NI = itab_ref.shape[0]
    H = n_heads
    P = _HEAD_PAD

    # ---- one-hot-matmul gather (replaces the serial per-row scalar gather loop):
    #   I_w.T = onehot(cq) @ weight_repr.T ,  I_q.T = onehot(sq) @ item_repr.T
    # Two tiny MXU matmuls on an otherwise-idle MXU; no serial SMEM loads, no masked
    # single-sublane stores, no VMEM scratch round-trip.
    cq_col = cq_ref[...]                                                 # [L, 1] int32
    sq_col = sq_ref[...]                                                 # [L, 1] int32
    oh_w = (cq_col == jax.lax.broadcasted_iota(jnp.int32, (L, W), 1)).astype(f32)
    oh_i = (sq_col == jax.lax.broadcasted_iota(jnp.int32, (L, NI), 1)).astype(f32)
    iw_t = jnp.dot(oh_w, wtab_ref[...], preferred_element_type=f32)      # [L, E]
    iq_t = jnp.dot(oh_i, itab_ref[...], preferred_element_type=f32)      # [L, E]
    iqt_ref[...] = iq_t
    x = iw_t + iq_t                                                      # [L, E] == I.T

    # ---- fused, lane-padded QKV' projection: [L, E] @ [E, 3*H*128]
    # Per-head blocks are zero-padded to 128 lanes so every per-head slice below is a
    # whole-vreg selection (no XLU lane rotates).  1/sqrt(E) is folded into Q and
    # Head_agg is folded into V' at prepare time.
    qkv = jnp.dot(x, wqkv_ref[...], preferred_element_type=f32)          # [L, 3*H*P]

    # Causal mask built in-kernel: query j sees key i iff i <= j (matches torch Mask).
    qi = jax.lax.broadcasted_iota(jnp.int32, (L, L), 0)
    ki = jax.lax.broadcasted_iota(jnp.int32, (L, L), 1)
    visible = ki <= qi
    neg_big = jnp.float32(-1e30)   # finite "-inf": exp() underflows to exactly 0

    acc = jnp.zeros((L, P), f32)
    for h in range(H):                                                   # H small & static
        q_h = qkv[:, h * P:(h + 1) * P]                                  # [L, P]
        k_h = qkv[:, (H + h) * P:(H + h + 1) * P]                        # [L, P]
        v_h = qkv[:, (2 * H + h) * P:(2 * H + h + 1) * P]                # [L, P] (Head_agg folded)

        # s[j, i] = sum_e q[j, e] * k[i, e]   (scale already folded into Q)
        s = jax.lax.dot_general(q_h, k_h, (((1,), (1,)), ((), ())),
                                preferred_element_type=f32)              # [L, L]
        s = jnp.where(visible, s, neg_big)

        # softmax over the key axis (== torch.softmax(s, dim=1) in original layout)
        m = jnp.max(s, axis=-1, keepdims=True)
        p = jnp.exp(s - m)
        denom = jnp.sum(p, axis=-1, keepdims=True)
        att_t = p * pl.reciprocal(denom, approx=True)                    # EUP reciprocal

        # Head_agg already folded into v_h -> accumulate the state contribution.
        acc = acc + jnp.dot(att_t, v_h, preferred_element_type=f32)      # [L, P]

    state = acc[:, :E]                                                   # [L, E] == o.T (pad lanes are 0)

    # ---- post-processing folded in-kernel (no wrapper-side concat / slices):
    #   hist = [user_init ; state[:-1]],  last = state[-1]
    hist_ref[0:1, :] = uinit_ref[...]
    if L > 1:
        hist_ref[1:L, :] = state[0:L - 1, :]
    last_ref[...] = state[L - 1:L, :]


def prepare_params(params):
    """One-time weight prep hoisted out of the per-call path.

    - fuses W_q / W_k / W_v' into a single projection weight
    - folds 1/sqrt(E) into the Q columns
    - folds Head_agg into V (Wv'_h = HeadAgg_h @ Wv_h) so the kernel accumulates the
      final state directly in the head loop
    - zero-pads each per-head block to 128 lanes (128-lane aligned in-kernel slices)
    Compute stays f32 to match the PyTorch module numerics; this kernel is
    latency/issue-bound, not bandwidth-bound.
    """
    f32 = jnp.float32
    E = params["W_q"].shape[1]
    H = params["W_q"].shape[0] // E
    P = _HEAD_PAD
    red = 1.0 / (float(E) ** 0.5)

    Wq = params["W_q"].astype(f32) * red          # fold 1/sqrt(E) into Q
    Wk = params["W_k"].astype(f32)
    Wv = params["W_v"].astype(f32)
    Ha = params["Head_agg"].astype(f32)           # [E, H*E]

    pad = jnp.zeros((E, P - E), f32)

    def block(w):                                 # [E_out, E_in] -> padded [E_in, P]
        return jnp.concatenate([w.T, pad], axis=1)

    q_blocks = [block(Wq[h * E:(h + 1) * E, :]) for h in range(H)]
    k_blocks = [block(Wk[h * E:(h + 1) * E, :]) for h in range(H)]
    v_blocks = [block(Ha[:, h * E:(h + 1) * E] @ Wv[h * E:(h + 1) * E, :]) for h in range(H)]
    wqkv_pad = jnp.concatenate(q_blocks + k_blocks + v_blocks, axis=1)   # [E, 3*H*P]

    return {
        "user_init": params["user_init_representation"].astype(f32),    # [1, E]
        "wtab": params["weight_representations"].astype(f32).T,         # [W, E]
        "wqkv_pad": wqkv_pad,                                           # [E, 3*H*128]
    }


def prepare_items(item_representations):
    """One-time item-table prep (cast + transpose) hoisted out of the per-call path."""
    return item_representations.astype(jnp.float32).T                   # [n_items, E]


def transformer_forward(prep, sq, cq, itab):
    """Mirrors Trasnsformer_model.forward. Returns (u_state[:-1], I_q.T, u_state[-1]).

    Single pallas_call, single grid point: all operands are tiny and whole-array VMEM
    resident, so a grid would only add per-step overhead.  Gather, projection,
    attention and the u_state concat/slices all happen inside the kernel.
    """
    E = prep["user_init"].shape[1]
    H = prep["wqkv_pad"].shape[1] // (3 * _HEAD_PAD)
    L = sq.shape[0]

    vmem = pl.BlockSpec(memory_space=pltpu.MemorySpace.VMEM)
    kernel = functools.partial(_transformer_kernel, n_heads=H)

    # TODO(synk): if multiple (sq, cq) sequences are evaluated together, add a leading
    # batch grid axis marked "parallel" (uses both v7x TensorCores and feeds the MXU real M).
    # TODO(synk): for variable-length production use, pad sq/cq to MAX_LENGTH once and mask
    # the tail rather than specializing the trace on L (JAX shapes keep L static anyway).
    hist, iq_t, last = pl.pallas_call(
        kernel,
        out_shape=(jax.ShapeDtypeStruct((L, E), jnp.float32),    # hist == u_state[:-1]
                   jax.ShapeDtypeStruct((L, E), jnp.float32),    # I_q.T
                   jax.ShapeDtypeStruct((1, E), jnp.float32)),   # last == u_state[-1]
        in_specs=[vmem] * 6,
        out_specs=(vmem, vmem, vmem),
    )(cq.astype(jnp.int32).reshape(L, 1),   # [L,1] column (free reshape) for lane-broadcast compare
      sq.astype(jnp.int32).reshape(L, 1),
      prep["wtab"], itab, prep["wqkv_pad"], prep["user_init"])

    return hist, iq_t, last.reshape(E)


def _reference_forward(params, sq, cq, item_representations):
    """Pure-JAX transcription of the PyTorch forward (numerical oracle)."""
    E = params["W_q"].shape[1]
    H = params["W_q"].shape[0] // E
    L = sq.shape[0]
    I_w = params["weight_representations"][:, cq]
    I_q = item_representations[:, sq]
    I = I_w + I_q
    q = (params["W_q"] @ I).reshape(H, E, L)
    k = (params["W_k"] @ I).reshape(H, E, L)
    v = (params["W_v"] @ I).reshape(H, E, L)
    ii = jnp.arange(L)[:, None]
    jj = jnp.arange(L)[None, :]
    mask = jnp.where(ii <= jj, 0.0, -jnp.inf).astype(jnp.float32)
    score = jnp.einsum("hel,hem->hlm", k, q) / jnp.sqrt(jnp.float32(E))
    s = score + mask[None]
    att = jax.nn.softmax(s, axis=1)
    b = jnp.einsum("hel,hlm->hem", v, att).reshape(H * E, L)
    o = params["Head_agg"] @ b
    state = o.T
    u_state = jnp.concatenate([params["user_init_representation"], state], axis=0)
    return u_state[:-1, :], I_q.T, u_state[-1, :]


if __name__ == "__main__":
    # Small, deterministic configuration
    EMBEDDING_SIZE = 32
    N_HEADS = 4
    MAX_LENGTH = 16
    WEIGHT_AMOUNT = 16
    N_ITEMS = 10
    LENGTH = 8

    key = jax.random.PRNGKey(0)
    ks = jax.random.split(key, 9)

    params = {
        "user_init_representation": jax.random.normal(ks[0], (1, EMBEDDING_SIZE), jnp.float32) * 0.01,
        "weight_representations": jax.random.normal(ks[1], (EMBEDDING_SIZE, WEIGHT_AMOUNT), jnp.float32) * 0.01,
        "W_q": jax.random.normal(ks[2], (EMBEDDING_SIZE * N_HEADS, EMBEDDING_SIZE), jnp.float32) * 0.01,
        "W_k": jax.random.normal(ks[3], (EMBEDDING_SIZE * N_HEADS, EMBEDDING_SIZE), jnp.float32) * 0.01,
        "W_v": jax.random.normal(ks[4], (EMBEDDING_SIZE * N_HEADS, EMBEDDING_SIZE), jnp.float32) * 0.01,
        "Head_agg": jax.random.normal(ks[5], (EMBEDDING_SIZE, N_HEADS * EMBEDDING_SIZE), jnp.float32) * 0.01,
    }
    item_representations = jax.random.normal(ks[6], (EMBEDDING_SIZE, N_ITEMS), jnp.float32) * 0.01
    sq = jax.random.randint(ks[7], (LENGTH,), 0, N_ITEMS)
    cq = jax.random.randint(ks[8], (LENGTH,), 0, WEIGHT_AMOUNT)

    prep = prepare_params(params)          # one-time weight fusion / padding / transposes
    itab = prepare_items(item_representations)   # one-time item-table prep
    fwd = jax.jit(transformer_forward)

    hist, iq_t, last = fwd(prep, sq, cq, itab)
    jax.block_until_ready((hist, iq_t, last))

    assert hist.shape == (LENGTH, EMBEDDING_SIZE)
    assert iq_t.shape == (LENGTH, EMBEDDING_SIZE)
    assert last.shape == (EMBEDDING_SIZE,)
    assert jnp.all(jnp.isfinite(hist)) and jnp.all(jnp.isfinite(last))

    # Numerical check against a pure-JAX transcription of the PyTorch forward.
    ref_hist, ref_iqt, ref_last = _reference_forward(params, sq, cq, item_representations)
    # One-hot MXU gather is not guaranteed bit-identical to an XLA gather -> allclose.
    assert jnp.allclose(iq_t, ref_iqt, rtol=5e-3, atol=1e-6)
    assert jnp.allclose(hist, ref_hist, rtol=2e-2, atol=5e-6)
    assert jnp.allclose(last, ref_last, rtol=2e-2, atol=5e-6)

    print("KERNEL_OK")
</pallas_src>

<mosaic_0001>
module attributes {stable_mosaic.version = 11 : i64} {
  func.func @_transformer_kernel(%arg0: memref<8x1xi32, #tpu.memory_space<vmem>>, %arg1: memref<8x1xi32, #tpu.memory_space<vmem>>, %arg2: memref<16x32xf32, #tpu.memory_space<vmem>>, %arg3: memref<10x32xf32, #tpu.memory_space<vmem>>, %arg4: memref<32x1536xf32, #tpu.memory_space<vmem>>, %arg5: memref<1x32xf32, #tpu.memory_space<vmem>>, %arg6: memref<8x32xf32, #tpu.memory_space<vmem>>, %arg7: memref<8x32xf32, #tpu.memory_space<vmem>>, %arg8: memref<1x32xf32, #tpu.memory_space<vmem>>) attributes {dimension_semantics = [], scalar_prefetch = 0 : i64, scratch_operands = 0 : i64, tpu.core_type = #tpu.core_type<tc>} {
    %c0 = arith.constant 0 : index
    %c0_0 = arith.constant 0 : index
    %0 = vector.load %arg0[%c0, %c0_0] : memref<8x1xi32, #tpu.memory_space<vmem>>, vector<8x1xi32>
    %c0_1 = arith.constant 0 : index
    %c0_2 = arith.constant 0 : index
    %1 = vector.load %arg1[%c0_1, %c0_2] : memref<8x1xi32, #tpu.memory_space<vmem>>, vector<8x1xi32>
    %2 = tpu.iota {dimensions = array<i32: 1>} : vector<8x16xi32>
    %3 = vector.broadcast %0 : vector<8x1xi32> to vector<8x16xi32>
    %4 = arith.cmpi eq, %3, %2 : vector<8x16xi32>
    %5 = arith.extui %4 : vector<8x16xi1> to vector<8x16xi32>
    %6 = arith.sitofp %5 : vector<8x16xi32> to vector<8x16xf32>
    %7 = tpu.iota {dimensions = array<i32: 1>} : vector<8x10xi32>
    %8 = vector.broadcast %1 : vector<8x1xi32> to vector<8x10xi32>
    %9 = arith.cmpi eq, %8, %7 : vector<8x10xi32>
    %10 = arith.extui %9 : vector<8x10xi1> to vector<8x10xi32>
    %11 = arith.sitofp %10 : vector<8x10xi32> to vector<8x10xf32>
    %c0_3 = arith.constant 0 : index
    %c0_4 = arith.constant 0 : index
    %12 = vector.load %arg2[%c0_3, %c0_4] : memref<16x32xf32, #tpu.memory_space<vmem>>, vector<16x32xf32>
    %cst = arith.constant dense<0.000000e+00> : vector<8x32xf32>
    %13 = tpu.matmul %6, %12, %cst {dimension_numbers = #tpu.dot_dimension_numbers<[1], [0], [0], [1], [0, 0, 1, 1], [], []>} : vector<8x16xf32>, vector<16x32xf32>, vector<8x32xf32> -> vector<8x32xf32>
    %c0_5 = arith.constant 0 : index
    %c0_6 = arith.constant 0 : index
    %14 = vector.load %arg3[%c0_5, %c0_6] : memref<10x32xf32, #tpu.memory_space<vmem>>, vector<10x32xf32>
    %cst_7 = arith.constant dense<0.000000e+00> : vector<8x32xf32>
    %15 = tpu.matmul %11, %14, %cst_7 {dimension_numbers = #tpu.dot_dimension_numbers<[1], [0], [0], [1], [0, 0, 1, 1], [], []>} : vector<8x10xf32>, vector<10x32xf32>, vector<8x32xf32> -> vector<8x32xf32>
    %c0_8 = arith.constant 0 : index
    %c0_9 = arith.constant 0 : index
    %16 = vector.load %arg7[%c0_8, %c0_9] : memref<8x32xf32, #tpu.memory_space<vmem>>, vector<8x32xf32>
    tpu.vector_store %arg7[%c0_8, %c0_9], %15 {strides = array<i32>} : memref<8x32xf32, #tpu.memory_space<vmem>>, vector<8x32xf32>,
    %17 = arith.addf %13, %15 : vector<8x32xf32>
    %c0_10 = arith.constant 0 : index
    %c0_11 = arith.constant 0 : index
    %18 = vector.load %arg4[%c0_10, %c0_11] : memref<32x1536xf32, #tpu.memory_space<vmem>>, vector<32x1536xf32>
    %cst_12 = arith.constant dense<0.000000e+00> : vector<8x1536xf32>
    %19 = tpu.matmul %17, %18, %cst_12 {dimension_numbers = #tpu.dot_dimension_numbers<[1], [0], [0], [1], [0, 0, 1, 1], [], []>} : vector<8x32xf32>, vector<32x1536xf32>, vector<8x1536xf32> -> vector<8x1536xf32>
    %20 = tpu.iota {dimensions = array<i32: 0>} : vector<8x8xi32>
    %21 = tpu.iota {dimensions = array<i32: 1>} : vector<8x8xi32>
    %22 = arith.cmpi sle, %21, %20 : vector<8x8xi32>
    %cst_13 = arith.constant 0.000000e+00 : f32
    %23 = vector.broadcast %cst_13 : f32 to vector<8x128xf32>
    %24 = vector.extract_strided_slice %19 {offsets = [0, 0], sizes = [8, 128], strides = [1, 1]} : vector<8x1536xf32> to vector<8x128xf32>
    %25 = vector.extract_strided_slice %19 {offsets = [0, 512], sizes = [8, 128], strides = [1, 1]} : vector<8x1536xf32> to vector<8x128xf32>
    %26 = vector.extract_strided_slice %19 {offsets = [0, 1024], sizes = [8, 128], strides = [1, 1]} : vector<8x1536xf32> to vector<8x128xf32>
    %cst_14 = arith.constant dense<0.000000e+00> : vector<8x8xf32>
    %27 = tpu.matmul %24, %25, %cst_14 {dimension_numbers = #tpu.dot_dimension_numbers<[1], [1], [0], [0], [0, 0, 1, 0], [], []>} : vector<8x128xf32>, vector<8x128xf32>, vector<8x8xf32> -> vector<8x8xf32>
    %cst_15 = arith.constant -1.000000e+30 : f32
    %28 = vector.broadcast %cst_15 : f32 to vector<8x8xf32>
    %29 = arith.select %22, %27, %28 : vector<8x8xi1>, vector<8x8xf32>
    %cst_16 = arith.constant dense<0xFF800000> : vector<8xf32>
    %30 = vector.multi_reduction <maximumf>, %29, %cst_16 [1] : vector<8x8xf32> to vector<8xf32>
    %31 = vector.shape_cast %30 : vector<8xf32> to vector<8x1xf32>
    %32 = vector.broadcast %31 : vector<8x1xf32> to vector<8x8xf32>
    %33 = arith.subf %29, %32 : vector<8x8xf32>
    %34 = math.exp %33 : vector<8x8xf32>
    %cst_17 = arith.constant dense<0.000000e+00> : vector<8xf32>
    %35 = vector.multi_reduction <add>, %34, %cst_17 [1] : vector<8x8xf32> to vector<8xf32>
    %36 = vector.shape_cast %35 : vector<8xf32> to vector<8x1xf32>
    %37 = tpu.reciprocal %36 {approx = true} : vector<8x1xf32> -> vector<8x1xf32>
    %38 = vector.broadcast %37 : vector<8x1xf32> to vector<8x8xf32>
    %39 = arith.mulf %34, %38 : vector<8x8xf32>
    %cst_18 = arith.constant dense<0.000000e+00> : vector<8x128xf32>
    %40 = tpu.matmul %39, %26, %cst_18 {dimension_numbers = #tpu.dot_dimension_numbers<[1], [0], [0], [1], [0, 0, 1, 1], [], []>} : vector<8x8xf32>, vector<8x128xf32>, vector<8x128xf32> -> vector<8x128xf32>
    %41 = arith.addf %23, %40 : vector<8x128xf32>
    %42 = vector.extract_strided_slice %19 {offsets = [0, 128], sizes = [8, 128], strides = [1, 1]} : vector<8x1536xf32> to vector<8x128xf32>
    %43 = vector.extract_strided_slice %19 {offsets = [0, 640], sizes = [8, 128], strides = [1, 1]} : vector<8x1536xf32> to vector<8x128xf32>
    %44 = vector.extract_strided_slice %19 {offsets = [0, 1152], sizes = [8, 128], strides = [1, 1]} : vector<8x1536xf32> to vector<8x128xf32>
    %cst_19 = arith.constant dense<0.000000e+00> : vector<8x8xf32>
    %45 = tpu.matmul %42, %43, %cst_19 {dimension_numbers = #tpu.dot_dimension_numbers<[1], [1], [0], [0], [0, 0, 1, 0], [], []>} : vector<8x128xf32>, vector<8x128xf32>, vector<8x8xf32> -> vector<8x8xf32>
    %cst_20 = arith.constant -1.000000e+30 : f32
    %46 = vector.broadcast %cst_20 : f32 to vector<8x8xf32>
    %47 = arith.select %22, %45, %46 : vector<8x8xi1>, vector<8x8xf32>
    %cst_21 = arith.constant dense<0xFF800000> : vector<8xf32>
    %48 = vector.multi_reduction <maximumf>, %47, %cst_21 [1] : vector<8x8xf32> to vector<8xf32>
    %49 = vector.shape_cast %48 : vector<8xf32> to vector<8x1xf32>
    %50 = vector.broadcast %49 : vector<8x1xf32> to vector<8x8xf32>
    %51 = arith.subf %47, %50 : vector<8x8xf32>
    %52 = math.exp %51 : vector<8x8xf32>
    %cst_22 = arith.constant dense<0.000000e+00> : vector<8xf32>
    %53 = vector.multi_reduction <add>, %52, %cst_22 [1] : vector<8x8xf32> to vector<8xf32>
    %54 = vector.shape_cast %53 : vector<8xf32> to vector<8x1xf32>
    %55 = tpu.reciprocal %54 {approx = true} : vector<8x1xf32> -> vector<8x1xf32>
    %56 = vector.broadcast %55 : vector<8x1xf32> to vector<8x8xf32>
    %57 = arith.mulf %52, %56 : vector<8x8xf32>
    %cst_23 = arith.constant dense<0.000000e+00> : vector<8x128xf32>
    %58 = tpu.matmul %57, %44, %cst_23 {dimension_numbers = #tpu.dot_dimension_numbers<[1], [0], [0], [1], [0, 0, 1, 1], [], []>} : vector<8x8xf32>, vector<8x128xf32>, vector<8x128xf32> -> vector<8x128xf32>
    %59 = arith.addf %41, %58 : vector<8x128xf32>
    %60 = vector.extract_strided_slice %19 {offsets = [0, 256], sizes = [8, 128], strides = [1, 1]} : vector<8x1536xf32> to vector<8x128xf32>
    %61 = vector.extract_strided_slice %19 {offsets = [0, 768], sizes = [8, 128], strides = [1, 1]} : vector<8x1536xf32> to vector<8x128xf32>
    %62 = vector.extract_strided_slice %19 {offsets = [0, 1280], sizes = [8, 128], strides = [1, 1]} : vector<8x1536xf32> to vector<8x128xf32>
    %cst_24 = arith.constant dense<0.000000e+00> : vector<8x8xf32>
    %63 = tpu.matmul %60, %61, %cst_24 {dimension_numbers = #tpu.dot_dimension_numbers<[1], [1], [0], [0], [0, 0, 1, 0], [], []>} : vector<8x128xf32>, vector<8x128xf32>, vector<8x8xf32> -> vector<8x8xf32>
    %cst_25 = arith.constant -1.000000e+30 : f32
    %64 = vector.broadcast %cst_25 : f32 to vector<8x8xf32>
    %65 = arith.select %22, %63, %64 : vector<8x8xi1>, vector<8x8xf32>
    %cst_26 = arith.constant dense<0xFF800000> : vector<8xf32>
    %66 = vector.multi_reduction <maximumf>, %65, %cst_26 [1] : vector<8x8xf32> to vector<8xf32>
    %67 = vector.shape_cast %66 : vector<8xf32> to vector<8x1xf32>
    %68 = vector.broadcast %67 : vector<8x1xf32> to vector<8x8xf32>
    %69 = arith.subf %65, %68 : vector<8x8xf32>
    %70 = math.exp %69 : vector<8x8xf32>
    %cst_27 = arith.constant dense<0.000000e+00> : vector<8xf32>
    %71 = vector.multi_reduction <add>, %70, %cst_27 [1] : vector<8x8xf32> to vector<8xf32>
    %72 = vector.shape_cast %71 : vector<8xf32> to vector<8x1xf32>
    %73 = tpu.reciprocal %72 {approx = true} : vector<8x1xf32> -> vector<8x1xf32>
    %74 = vector.broadcast %73 : vector<8x1xf32> to vector<8x8xf32>
    %75 = arith.mulf %70, %74 : vector<8x8xf32>
    %cst_28 = arith.constant dense<0.000000e+00> : vector<8x128xf32>
    %76 = tpu.matmul %75, %62, %cst_28 {dimension_numbers = #tpu.dot_dimension_numbers<[1], [0], [0], [1], [0, 0, 1, 1], [], []>} : vector<8x8xf32>, vector<8x128xf32>, vector<8x128xf32> -> vector<8x128xf32>
    %77 = arith.addf %59, %76 : vector<8x128xf32>
    %78 = vector.extract_strided_slice %19 {offsets = [0, 384], sizes = [8, 128], strides = [1, 1]} : vector<8x1536xf32> to vector<8x128xf32>
    %79 = vector.extract_strided_slice %19 {offsets = [0, 896], sizes = [8, 128], strides = [1, 1]} : vector<8x1536xf32> to vector<8x128xf32>
    %80 = vector.extract_strided_slice %19 {offsets = [0, 1408], sizes = [8, 128], strides = [1, 1]} : vector<8x1536xf32> to vector<8x128xf32>
    %cst_29 = arith.constant dense<0.000000e+00> : vector<8x8xf32>
    %81 = tpu.matmul %78, %79, %cst_29 {dimension_numbers = #tpu.dot_dimension_numbers<[1], [1], [0], [0], [0, 0, 1, 0], [], []>} : vector<8x128xf32>, vector<8x128xf32>, vector<8x8xf32> -> vector<8x8xf32>
    %cst_30 = arith.constant -1.000000e+30 : f32
    %82 = vector.broadcast %cst_30 : f32 to vector<8x8xf32>
    %83 = arith.select %22, %81, %82 : vector<8x8xi1>, vector<8x8xf32>
    %cst_31 = arith.constant dense<0xFF800000> : vector<8xf32>
    %84 = vector.multi_reduction <maximumf>, %83, %cst_31 [1] : vector<8x8xf32> to vector<8xf32>
    %85 = vector.shape_cast %84 : vector<8xf32> to vector<8x1xf32>
    %86 = vector.broadcast %85 : vector<8x1xf32> to vector<8x8xf32>
    %87 = arith.subf %83, %86 : vector<8x8xf32>
    %88 = math.exp %87 : vector<8x8xf32>
    %cst_32 = arith.constant dense<0.000000e+00> : vector<8xf32>
    %89 = vector.multi_reduction <add>, %88, %cst_32 [1] : vector<8x8xf32> to vector<8xf32>
    %90 = vector.shape_cast %89 : vector<8xf32> to vector<8x1xf32>
    %91 = tpu.reciprocal %90 {approx = true} : vector<8x1xf32> -> vector<8x1xf32>
    %92 = vector.broadcast %91 : vector<8x1xf32> to vector<8x8xf32>
    %93 = arith.mulf %88, %92 : vector<8x8xf32>
    %cst_33 = arith.constant dense<0.000000e+00> : vector<8x128xf32>
    %94 = tpu.matmul %93, %80, %cst_33 {dimension_numbers = #tpu.dot_dimension_numbers<[1], [0], [0], [1], [0, 0, 1, 1], [], []>} : vector<8x8xf32>, vector<8x128xf32>, vector<8x128xf32> -> vector<8x128xf32>
    %95 = arith.addf %77, %94 : vector<8x128xf32>
    %96 = vector.extract_strided_slice %95 {offsets = [0, 0], sizes = [8, 32], strides = [1, 1]} : vector<8x128xf32> to vector<8x32xf32>
    %c0_34 = arith.constant 0 : index
    %c0_35 = arith.constant 0 : index
    %97 = vector.load %arg5[%c0_34, %c0_35] : memref<1x32xf32, #tpu.memory_space<vmem>>, vector<1x32xf32>
    %c0_36 = arith.constant 0 : index
    %c0_37 = arith.constant 0 : index
    %98 = vector.load %arg6[%c0_36, %c0_37] : memref<8x32xf32, #tpu.memory_space<vmem>>, vector<1x32xf32>
    tpu.vector_store %arg6[%c0_36, %c0_37], %97 {strides = array<i32>} : memref<8x32xf32, #tpu.memory_space<vmem>>, vector<1x32xf32>,
    %99 = vector.extract_strided_slice %96 {offsets = [0, 0], sizes = [7, 32], strides = [1, 1]} : vector<8x32xf32> to vector<7x32xf32>
    %c1 = arith.constant 1 : index
    %c0_38 = arith.constant 0 : index
    %100 = vector.load %arg6[%c1, %c0_38] : memref<8x32xf32, #tpu.memory_space<vmem>>, vector<7x32xf32>
    tpu.vector_store %arg6[%c1, %c0_38], %99 {strides = array<i32>} : memref<8x32xf32, #tpu.memory_space<vmem>>, vector<7x32xf32>,
    %101 = vector.extract_strided_slice %96 {offsets = [7, 0], sizes = [1, 32], strides = [1, 1]} : vector<8x32xf32> to vector<1x32xf32>
    %c0_39 = arith.constant 0 : index
    %c0_40 = arith.constant 0 : index
    %102 = vector.load %arg8[%c0_39, %c0_40] : memref<1x32xf32, #tpu.memory_space<vmem>>, vector<1x32xf32>
    tpu.vector_store %arg8[%c0_39, %c0_40], %101 {strides = array<i32>} : memref<1x32xf32, #tpu.memory_space<vmem>>, vector<1x32xf32>,
    return
  }
}

</mosaic_0001>

<bundles_post_ra>
// kernel: transformer_forward.1
= control target key start
LH: loop header
LB: loop body
LE: loop exit
PB: predicated region body
PF: predicated region fallthrough
CT: control target
= control target key end

     0   :  { %14 = vsyncpa [#allocation3], 0  ;;  %s1854_s0 = inlined_call_operand.vmem [shape: s32[8,1], index: 0, kind: input, shape index: {}]   ;;  %s1855_s1 = inlined_call_operand.vmem [shape: s32[8,1], index: 1, kind: input, shape index: {}]   ;;  %s1856_s2 = inlined_call_operand.vmem [shape: f32[16,32], index: 2, kind: input, shape index: {}]   ;;  %s1857_s3 = inlined_call_operand.vmem [shape: f32[10,32], index: 3, kind: input, shape index: {}]   ;;  %s1858_s4 = inlined_call_operand.hbm [shape: f32[32,1536], index: 4, kind: input, shape index: {}]   ;;  %s1859_s5 = inlined_call_operand.vmem [shape: f32[1,32], index: 5, kind: input, shape index: {}]   ;;  %s1860_s6 = inlined_call_operand.hbm [shape: f32[8,32], index: 6, kind: output, shape index: {0}]   ;;  %s1861_s7 = inlined_call_operand.hbm [shape: f32[8,32], index: 7, kind: output, shape index: {1}]   ;;  %s1862_s8 = inlined_call_operand.hbm [shape: f32[1,32], index: 8, kind: output, shape index: {2}]  }
   0x1   :  { %15 = vsyncpa [#allocation4], 0 }
   0x2   :  { %16 = vsyncpa [#allocation7], 0  ;;  %s1642_s27 = smov [#allocation2]   ;;  %s1548_s9 = scalar_lea.hbm %s1858_s4, 6144 }
   0x3   :  { %s30_s28 = sshll.u32 %s1642_s27, 4  ;;  %p1549_p0 = scmp.ne.s32.totalorder %s1858_s4, %s1548_s9  ;;  %s31_s28 = int_to_ptr.vmem [resolvable:$true] %s30_s28 }
   0x4   :  { %p1552_p1 = scmp.lt.u32.totalorder %s1548_s9, %s1858_s4 }
   0x6   :  { %p1554_p2 = pnand %p1552_p1, %p1549_p0 }
   0x8   :  { %1557 = shalt.err (!%p1554_p2)
}
   0x9   :  { %s1558_s14 = scalar_lea.vmem %s31_s28, 6144  ;;  %p1563_p4 = scmp.lt.s32.totalorder %s31_s28, %s31_s28 }
   0xa   :  { %p1559_p3 = scmp.ne.s32.totalorder %s31_s28, %s1558_s14  ;;  %p1564_p5 = scmp.lt.s32.totalorder %s1558_s14, %s1558_s14 }
   0xc   :  { %p1565_p6 = por %p1564_p5, %p1563_p4 }
   0xe   :  { %p1566_p7 = pnand %p1565_p6, %p1559_p3 }
  0x10   :  { %1569 = shalt.err (!%p1566_p7)
}
  0x11   :  { %s1643_s15 = smov 1536   ;;  %s1644_s16 = smov 96  }
  0x12   :  { %36 = dma.hbm_to_vmem [thread:$0]  %s1858_s4, 6144, %s31_s28, [#allocation3], %s1643_s15, %s1643_s15, %s1644_s16  }
  0x13   :  { %1636 = dma.done.wait [#allocation3], 6144  }
  0x14   :  { %1637 = vsyncadd [#allocation3], 4294961152  ;;  %v1645_v0 = vmov 0   ;;  %v1646_v1 = vmov 0.0|0.0   ;;  %v1647_v2 = vmov 0.0   ;;  %vm66_vm0 = vcmask 1041408  }
  0x15   :  { %1531 = vset.pattern.permute.xlu0 %v1645_v0  ;;  %1459 = vmatprep.subr.bf16.mxu1 %v1646_v1  ;;  %v43_v3 = vld [vmem:[%s1855_s1] sm:$0xff]  ;;  %v61_v5 = vld [vmem:[%s1857_s3 + $0x8] sm:$0x3]  ;;  %vm1648_vm1 = vmmov 1   ;;  %vm1649_vm3 = vmmov 0   ;;  %v44_v14 = vlaneseq  ;;  %v219_v18 = vld [vmem:[#allocation2 + $0x18] sm:$0xff] }
  0x16   :  { %331 = vmatprep.mubr.f32.mxu0 %v1647_v2  ;;  %v60_v4 = vld [vmem:[%s1857_s3] sm:$0xff]  ;;  %53 = vperm.xlu0 %1531, %v43_v3   ;;  %vm1461_vm2 = vmpackc.low %vm66_vm0, %vm1648_vm1  ;;  %v217_v8 = vld [vmem:[#allocation2 + $0x8] sm:$0xff]  ;;  %vm62_vm4 = vcmask 80896   ;;  %vm142_vm6 = vcmask 130048   ;;  %vm140_vm8 = vcmask 261120   ;;  %vm767_vm10 = vcmask 64512  }
  0x17   :  { %v42_v6 = vld [vmem:[%s1854_s0] sm:$0xff]  ;;  %v1460_v7 = vpack.c.bf16 %v61_v5, %v60_v4  ;;  %1409 = vmatprep.mubr.msk.f32.mxu1 %vm1649_vm3, %v1647_v2  ;;  %v229_v9 = vld [vmem:[#allocation2 + $0x68] sm:$0xff]  ;;  %v1726_v15 = vand.u32 127, %v44_v14  ;;  %v231_v19 = vld [vmem:[#allocation2 + $0x78] sm:$0xff]  ;;  %vm1320_vm11 = vcmask 253952  }
  0x18   :  { %v1466_v10 = vpack.c.bf16 %v229_v9, %v217_v8  ;;  %v216_v11 = vld [vmem:[#allocation2] sm:$0xff]  ;;  %v59_v17 = vld [vmem:[%s1856_s2 + $0x8] sm:$0xff]  ;;  %v1474_v22 = vpack.c.bf16 %v231_v19, %v219_v18  ;;  %v218_v23 = vld [vmem:[#allocation2 + $0x10] sm:$0xff] }
  0x19   :  { %1462 = vmatpush3.bf16.msk.msra.mxu1 %vm1461_vm2, %v1460_v7  ;;  %v228_v12 = vld [vmem:[#allocation2 + $0x60] sm:$0xff]  ;;  %v230_v24 = vld [vmem:[#allocation2 + $0x70] sm:$0xff]  ;;  %v241_v29 = vld [vmem:[#allocation2 + $0xc8] sm:$0xff] }
  0x1a   :  { %47 = vperm.xlu0 %1531, %v42_v6   ;;  %1463 = vmatprep.subr.bf16.mxu1 %v1646_v1  ;;  %v1468_v13 = vpack.c.bf16 %v228_v12, %v216_v11  ;;  %v58_v16 = vld [vmem:[%s1856_s2] sm:$0xff]  ;;  %v1476_v27 = vpack.c.bf16 %v230_v24, %v218_v23  ;;  %v253_v30 = vld [vmem:[#allocation2 + $0x128] sm:$0xff]  ;;  %v243_v31 = vld [vmem:[#allocation2 + $0xd8] sm:$0xff]  ;;  %s1650_s2 = smov [#allocation6]  }
  0x1b   :  { %1467 = vmatprep.subr.bf16.mxu0 %v1466_v10  ;;  %v1464_v21 = vpack.c.bf16 %v59_v17, %v58_v16  ;;  %v1470_v32 = vpack.c.bf16 %v253_v30, %v241_v29  ;;  %v255_v33 = vld [vmem:[#allocation2 + $0x138] sm:$0xff]  ;;  %v240_v34 = vld [vmem:[#allocation2 + $0xc0] sm:$0xff]  ;;  %v242_v38 = vld [vmem:[#allocation2 + $0xd0] sm:$0xff]  ;;  %s1342_s27 = sshll.u32 %s1650_s2, 4  ;;  %s1343_s27 = int_to_ptr.vmem [resolvable:$true] %s1342_s27 }
  0x1c   :  { %1469 = vmatpush1.bf16.msra.mxu0 %v1468_v13  ;;  %v252_v35 = vld [vmem:[#allocation2 + $0x120] sm:$0xff]  ;;  %v1478_v36 = vpack.c.bf16 %v255_v33, %v243_v31  ;;  %v254_v39 = vld [vmem:[#allocation2 + $0x130] sm:$0xff]  ;;  %v221_v41 = vld [vmem:[#allocation2 + $0x28] sm:$0xff]  ;;  %s1570_s30 = scalar_lea.vmem %s1343_s27, 128  ;;  %p1575_p9 = scmp.lt.s32.totalorder %s1343_s27, %s1343_s27 }
  0x1d   :  { %v1472_v37 = vpack.c.bf16 %v252_v35, %v240_v34  ;;  %1471 = vmatprep.subr.bf16.mxu0 %v1470_v32  ;;  %v1480_v40 = vpack.c.bf16 %v254_v39, %v242_v38  ;;  %v233_v42 = vld [vmem:[#allocation2 + $0x88] sm:$0xff]  ;;  %v223_v43 = vld [vmem:[#allocation2 + $0x38] sm:$0xff]  ;;  %v220_v48 = vld [vmem:[#allocation2 + $0x20] sm:$0xff]  ;;  %p1571_p8 = scmp.ne.s32.totalorder %s1343_s27, %s1570_s30  ;;  %p1576_p10 = scmp.lt.s32.totalorder %s1570_s30, %s1570_s30 }
  0x1e   :  { %v1482_v44 = vpack.c.bf16 %v233_v42, %v221_v41  ;;  %v235_v45 = vld [vmem:[#allocation2 + $0x98] sm:$0xff]  ;;  %v232_v49 = vld [vmem:[#allocation2 + $0x80] sm:$0xff]  ;;  %v222_v51 = vld [vmem:[#allocation2 + $0x30] sm:$0xff] }
  0x1f   :  { %v1490_v46 = vpack.c.bf16 %v235_v45, %v223_v43  ;;  %v234_v52 = vld [vmem:[#allocation2 + $0x90] sm:$0xff]  ;;  %v245_v53 = vld [vmem:[#allocation2 + $0xe8] sm:$0xff]  ;;  %v247_v55 = vld [vmem:[#allocation2 + $0xf8] sm:$0xff]  ;;  %v1484_v58 = vpack.c.bf16 %v232_v49, %v220_v48  ;;  %v694_v45 = vshrl.u32 %v44_v14, 7  ;;  %p1577_p11 = por %p1576_p10, %p1575_p9 }
  0x20   :  { %1473 = vmatpush1.bf16.msra.mxu0 %v1472_v37  ;;  %v257_v54 = vld [vmem:[#allocation2 + $0x148] sm:$0xff]  ;;  %v259_v56 = vld [vmem:[#allocation2 + $0x158] sm:$0xff]  ;;  %v1492_v59 = vpack.c.bf16 %v234_v52, %v222_v51  ;;  %v244_v60 = vld [vmem:[#allocation2 + $0xe0] sm:$0xff] }
  0x21   :  { %1483 = vmatprep.subr.bf16.mxu0 %v1482_v44  ;;  %v256_v61 = vld [vmem:[#allocation2 + $0x140] sm:$0xff]  ;;  %v1486_v0 = vpack.c.bf16 %v257_v54, %v245_v53  ;;  %v1494_v1 = vpack.c.bf16 %v259_v56, %v247_v55  ;;  %v246_v3 = vld [vmem:[#allocation2 + $0xf0] sm:$0xff]  ;;  %v225_v5 = vld [vmem:[#allocation2 + $0x48] sm:$0xff]  ;;  %vm695_vm9 = vcmp.le.s32.totalorder %v1726_v15, %v694_v45  ;;  %p1578_p12 = pnand %p1577_p11, %p1571_p8 }
  0x22   :  { %v258_v4 = vld [vmem:[#allocation2 + $0x150] sm:$0xff]  ;;  %v237_v6 = vld [vmem:[#allocation2 + $0xa8] sm:$0xff]  ;;  %v227_v7 = vld [vmem:[#allocation2 + $0x58] sm:$0xff]  ;;  %v1488_v9 = vpack.c.bf16 %v256_v61, %v244_v60 }
  0x23   :  { %v239_v8 = vld [vmem:[#allocation2 + $0xb8] sm:$0xff]  ;;  %v1496_v10 = vpack.c.bf16 %v258_v4, %v246_v3  ;;  %v224_v11 = vld [vmem:[#allocation2 + $0x40] sm:$0xff]  ;;  %v1498_v13 = vpack.c.bf16 %v237_v6, %v225_v5  ;;  %v226_v17 = vld [vmem:[#allocation2 + $0x50] sm:$0xff] }
  0x24   :  { %v236_v12 = vld [vmem:[#allocation2 + $0xa0] sm:$0xff]  ;;  %v1506_v16 = vpack.c.bf16 %v239_v8, %v227_v7  ;;  %v238_v18 = vld [vmem:[#allocation2 + $0xb0] sm:$0xff]  ;;  %v249_v19 = vld [vmem:[#allocation2 + $0x108] sm:$0xff] }
  0x25   :  { %v1500_v23 = vpack.c.bf16 %v236_v12, %v224_v11  ;;  %v1508_v24 = vpack.c.bf16 %v238_v18, %v226_v17  ;;  %v250_v29 = vld [vmem:[#allocation2 + $0x110] sm:$0xff] }
  0x26   :  { %v262_v30 = vld [vmem:[#allocation2 + $0x170] sm:$0xff] }
  0x27   :  { %v1512_v32 = vpack.c.bf16 %v262_v30, %v250_v29 }
  0x95   :  { %v54_v20 = vpop.permute.xlu0 %53 }
  0x96   :  { %vm55_vm5 = vcmp.eq.s32.totalorder %v54_v20, %v1726_v15  ;;  %v261_v20 = vld [vmem:[#allocation2 + $0x168] sm:$0xff] }
  0x97   :  { %v1369_v25 = vsel %vm55_vm5, 1.0, %v1647_v2 }
  0x98   :  { %1410 = vmatmul.mubr.msk.f32.vlgmr.msra.gmra.mrb[0].mxu1 %vm62_vm4, %v1369_v25  ;;  %v248_v25 = vld [vmem:[#allocation2 + $0x100] sm:$0xff] }
  0x99   :  { %1465 = vmatpush3.bf16.msra.mxu1 %v1464_v21  ;;  %v48_v26 = vpop.permute.xlu0 %47  ;;  %1416 = vmatprep.mubr.msk.f32.mxu1 %vm1649_vm3, %v1647_v2  ;;  %v251_v21 = vld [vmem:[#allocation2 + $0x118] sm:$0xff] }
  0x9a   :  { %vm49_vm7 = vcmp.eq.s32.totalorder %v48_v26, %v1726_v15  ;;  %1475 = vmatprep.subr.bf16.mxu1 %v1474_v22  ;;  %v263_v22 = vld [vmem:[#allocation2 + $0x178] sm:$0xff]  ;;  %v1502_v26 = vpack.c.bf16 %v261_v20, %v249_v19 }
  0x9b   :  { %v1368_v28 = vsel %vm49_vm7, 1.0, %v1647_v2 }
  0x9c   :  { %1417 = vmatmul.mubr.msk.f32.vlgmr.msra.gmra.mrb[2].mxu1 %vm142_vm6, %v1368_v28  ;;  %v260_v28 = vld [vmem:[#allocation2 + $0x160] sm:$0xff] }
  0x9d   :  { %1477 = vmatpush1.bf16.msra.mxu1 %v1476_v27  ;;  %402 = vmatprep.mubr.f32.mxu1 %v1647_v2  ;;  %v1510_v27 = vpack.c.bf16 %v263_v22, %v251_v21  ;;  %v1504_v31 = vpack.c.bf16 %v260_v28, %v248_v25 }
  0x9e   :  { %1479 = vmatprep.subr.bf16.mxu1 %v1478_v36 }
  0xa1   :  { %1481 = vmatpush1.bf16.msra.mxu1 %v1480_v40 }
  0xa2   :  { %1491 = vmatprep.subr.bf16.mxu1 %v1490_v46 }
 0x16b   :  { %v136_v47 = vpop.f32.mrb[0].mxu1 }
 0x16c   :  { %v1411_v50 = vpop.f32.mrb[1].mxu1  ;;  %141 = vst.msk [vmem:[#allocation6] sm:$0xff] %vm140_vm8, %v136_v47 }
 0x16f   :  { %v212_v57 = vpop.f32.mrb[2].mxu1 }
 0x170   :  { %v213_v62 = vadd.f32 %v212_v57, %v136_v47  ;;  %v1418_v63 = vpop.f32.mrb[3].mxu1 }
 0x172   :  { %1373 = vmatmul.mubr.msk.f32.vlgmr.msra.gmra.mrb[0].mxu0 %vm140_vm8, %v213_v62  ;;  %1374 = vmatmul.mubr.msk.f32.vlgmr.msra.gmra.mrb[4].mxu1 %vm140_vm8, %v213_v62 }
 0x173   :  { %1485 = vmatpush1.bf16.msra.mxu0 %v1484_v58  ;;  %1493 = vmatpush1.bf16.msra.mxu1 %v1492_v59 }
 0x174   :  { %1487 = vmatprep.subr.bf16.mxu0 %v1486_v0  ;;  %1495 = vmatprep.subr.bf16.mxu1 %v1494_v1 }
 0x175   :  { %473 = vmatprep.mubr.f32.mxu0 %v1647_v2  ;;  %544 = vmatprep.mubr.f32.mxu1 %v1647_v2 }
 0x177   :  { %1489 = vmatpush1.bf16.msra.mxu0 %v1488_v9  ;;  %1497 = vmatpush1.bf16.msra.mxu1 %v1496_v10 }
 0x178   :  { %1499 = vmatprep.subr.bf16.mxu0 %v1498_v13  ;;  %1507 = vmatprep.subr.bf16.mxu1 %v1506_v16 }
 0x17a   :  { %1375 = vmatmul.mubr.msk.f32.vlgmr.msra.gmra.mrb[2].mxu0 %vm140_vm8, %v213_v62  ;;  %1376 = vmatmul.mubr.msk.f32.vlgmr.msra.gmra.mrb[6].mxu1 %vm140_vm8, %v213_v62 }
 0x17b   :  { %1501 = vmatpush1.bf16.msra.mxu0 %v1500_v23  ;;  %1509 = vmatpush1.bf16.msra.mxu1 %v1508_v24 }
 0x17c   :  { %1503 = vmatprep.subr.bf16.mxu0 %v1502_v26  ;;  %1511 = vmatprep.subr.bf16.mxu1 %v1510_v27 }
 0x17d   :  { %615 = vmatprep.mubr.f32.mxu0 %v1647_v2  ;;  %686 = vmatprep.mubr.f32.mxu1 %v1647_v2 }
 0x17f   :  { %1505 = vmatpush1.bf16.msra.mxu0 %v1504_v31  ;;  %1513 = vmatpush1.bf16.msra.mxu1 %v1512_v32  ;;  %v1319_v31 = vld [vmem:[%s1859_s5] sm:$0x1] }
 0x180   :  { %1419 = vmatprep.subr.mxu0 %v1647_v2  ;;  %1424 = vmatprep.subr.mxu1 %v1647_v2 }
 0x182   :  { %1377 = vmatmul.mubr.msk.f32.vlgmr.msra.gmra.mrb[4].mxu0 %vm140_vm8, %v213_v62  ;;  %1378 = vmatmul.mubr.msk.f32.vlgmr.msra.gmra.mrb[8].mxu1 %vm140_vm8, %v213_v62 }
 0x183   :  { %1421 = vmatprep.mubr.msk.f32.mxu0 %vm1649_vm3, %v1647_v2  ;;  %1426 = vmatprep.mubr.msk.f32.mxu1 %vm1649_vm3, %v1647_v2 }
 0x245   :  { %v333_v33 = vpop.f32.mrb[0].mxu0  ;;  %v404_v34 = vpop.f32.mrb[4].mxu1 }
 0x246   :  { %v335_v35 = vpop.f32.mrb[1].mxu0  ;;  %v406_v36 = vpop.f32.mrb[5].mxu1 }
 0x24d   :  { %v475_v37 = vpop.f32.mrb[2].mxu0  ;;  %v546_v38 = vpop.f32.mrb[6].mxu1 }
 0x24e   :  { %v477_v39 = vpop.f32.mrb[3].mxu0  ;;  %v548_v40 = vpop.f32.mrb[7].mxu1  ;;  %1420 = vmatpush3.xpose.msra.mxu0 %v475_v37 }
 0x24f   :  { %1425 = vmatpush3.xpose.msra.mxu1 %v477_v39  ;;  %1429 = vmatprep.subr.mxu0 %v1647_v2 }
 0x250   :  { %1439 = vmatprep.subr.mxu1 %v1647_v2 }
 0x251   :  { %1422 = vmatmul.mubr.f32.vlgmr.msra.gmra.mrb[6].mxu0 %v333_v33 }
 0x252   :  { %1427 = vmatmul.mubr.f32.vlgmr.msra.gmra.mrb[10].mxu1 %v335_v35  ;;  %1431 = vmatprep.mubr.msk.f32.mxu0 %vm1649_vm3, %v1647_v2 }
 0x253   :  { %1440 = vmatpush3.xpose.msra.mxu1 %v546_v38  ;;  %1441 = vmatprep.mubr.msk.f32.mxu1 %vm1649_vm3, %v1647_v2 }
 0x254   :  { %1449 = vmatprep.subr.mxu1 %v1647_v2 }
 0x255   :  { %v1765_v41 = vpop.f32.mrb[4].mxu0  ;;  %v1767_v42 = vpop.f32.mrb[8].mxu1 }
 0x256   :  { %v619_v43 = vpop.f32.mrb[5].mxu0  ;;  %v1769_v44 = vpop.f32.mrb[9].mxu1  ;;  %1442 = vmatmul.mubr.f32.vlgmr.msra.gmra.mrb[12].mxu1 %v404_v34 }
 0x257   :  { %1430 = vmatpush3.msra.mxu0 %v619_v43  ;;  %1450 = vmatpush3.xpose.msra.mxu1 %v548_v40 }
 0x258   :  { %1451 = vmatprep.mubr.msk.f32.mxu1 %vm1649_vm3, %v1647_v2  ;;  %1434 = vmatprep.subr.mxu0 %v1647_v2 }
 0x25a   :  { %1452 = vmatmul.mubr.f32.vlgmr.msra.gmra.mrb[14].mxu1 %v406_v36 }
 0x324   :  { %v762_v46 = vpop.f32.mrb[6].mxu0 }
 0x325   :  { %v1423_v47 = vpop.f32.mrb[7].mxu0  ;;  %v845_v48 = vpop.f32.mrb[10].mxu1  ;;  %v766_v52 = vsel %vm695_vm9, %v762_v46, -1e+30 }
 0x326   :  { %v849_v49 = vsel %vm695_vm9, %v845_v48, -1e+30  ;;  %v1428_v50 = vpop.f32.mrb[11].mxu1  ;;  %v768_v55 = vsel %vm767_vm10, %v766_v52, -inf }
 0x327   :  { %v850_v51 = vsel %vm767_vm10, %v849_v49, -inf }
 0x328   :  { %851 = vmax.xlane.f32.xlu1 %v850_v51 }
 0x329   :  { %v1073_v53 = vpop.f32.mrb[12].mxu1 }
 0x32a   :  { %v1077_v14 = vsel %vm695_vm9, %v1073_v53, -1e+30  ;;  %v1443_v54 = vpop.f32.mrb[13].mxu1 }
 0x32b   :  { %v1078_v56 = vsel %vm767_vm10, %v1077_v14, -inf }
 0x32c   :  { %769 = vmax.xlane.f32.xlu1 %v768_v55  ;;  %1079 = vmax.xlane.f32.xlu0 %v1078_v56 }
 0x32d   :  { %v1229_v57 = vpop.f32.mrb[14].mxu1 }
 0x32e   :  { %v1233_v58 = vsel %vm695_vm9, %v1229_v57, -1e+30  ;;  %v1453_v59 = vpop.f32.mrb[15].mxu1 }
 0x32f   :  { %v1234_v60 = vsel %vm767_vm10, %v1233_v58, -inf }
 0x330   :  { %1235 = vmax.xlane.f32.xlu1 %v1234_v60 }
 0x3b5   :  { %v852_v61 = vpop.xlane.xlu1 %851 }
 0x3b6   :  { %v853_v62 = vsub.f32 %v849_v49, %v852_v61 }
 0x3b8   :  { %v854_v63 = vmul.f32 1.442695, %v853_v62 }
 0x3b9   :  { %v770_v0 = vpop.xlane.xlu1 %769  ;;  %v1080_v1 = vpop.xlane.xlu0 %1079 }
 0x3ba   :  { %1532 = vpow2.f32 %v854_v63  ;;  %v771_v3 = vsub.f32 %v766_v52, %v770_v0  ;;  %v1081_v4 = vsub.f32 %v1077_v14, %v1080_v1 }
 0x3bc   :  { %v772_v5 = vmul.f32 1.442695, %v771_v3  ;;  %v1082_v6 = vmul.f32 1.442695, %v1081_v4 }
 0x3bd   :  { %v1236_v7 = vpop.xlane.xlu1 %1235 }
 0x3be   :  { %1534 = vpow2.f32 %v772_v5  ;;  %v1237_v8 = vsub.f32 %v1233_v58, %v1236_v7 }
 0x3bf   :  { %1536 = vpow2.f32 %v1082_v6 }
 0x3c0   :  { %v1238_v15 = vmul.f32 1.442695, %v1237_v8 }
 0x3c2   :  { %1538 = vpow2.f32 %v1238_v15 }
 0x3c4   :  { %v1533_v9 = vpop.eup %1532 }
 0x3c5   :  { %v856_v10 = vsel %vm767_vm10, %v1533_v9, 0.0 }
 0x3c6   :  { %857 = vadd.xlane.f32.xlu1 %v856_v10 }
 0x3c8   :  { %v1535_v11 = vpop.eup %1534 }
 0x3c9   :  { %v774_v12 = vsel %vm767_vm10, %v1535_v11, 0.0  ;;  %v1537_v13 = vpop.eup %1536 }
 0x3ca   :  { %775 = vadd.xlane.f32.xlu1 %v774_v12  ;;  %v1084_v16 = vsel %vm767_vm10, %v1537_v13, 0.0 }
 0x3cc   :  { %v1539_v17 = vpop.eup %1538 }
 0x3cd   :  { %v1240_v18 = vsel %vm767_vm10, %v1539_v17, 0.0 }
 0x3ce   :  { %1085 = vadd.xlane.f32.xlu1 %v1084_v16 }
 0x3d2   :  { %1241 = vadd.xlane.f32.xlu1 %v1240_v18 }
 0x453   :  { %v858_v19 = vpop.xlane.xlu1 %857 }
 0x454   :  { %1540 = vrcp.f32 %v858_v19 }
 0x457   :  { %v776_v20 = vpop.xlane.xlu1 %775 }
 0x458   :  { %1542 = vrcp.f32 %v776_v20 }
 0x45b   :  { %v1086_v23 = vpop.xlane.xlu1 %1085 }
 0x45c   :  { %1544 = vrcp.f32 %v1086_v23 }
 0x45e   :  { %v1541_v21 = vpop.eup %1540 }
 0x45f   :  { %v860_v22 = vmul.f32 %v1541_v21, %v1533_v9  ;;  %v1242_v26 = vpop.xlane.xlu1 %1241 }
 0x460   :  { %1546 = vrcp.f32 %v1242_v26 }
 0x461   :  { %1432 = vmatmul.mubr.msk.f32.vlgmr.msra.gmra.mrb[8].mxu0 %vm767_vm10, %v860_v22 }
 0x462   :  { %1435 = vmatpush3.msra.mxu0 %v1765_v41  ;;  %1436 = vmatprep.mubr.msk.f32.mxu0 %vm1649_vm3, %v1647_v2  ;;  %v1543_v24 = vpop.eup %1542 }
 0x463   :  { %1444 = vmatprep.subr.mxu0 %v1647_v2  ;;  %v778_v25 = vmul.f32 %v1543_v24, %v1535_v11 }
 0x466   :  { %v1545_v27 = vpop.eup %1544 }
 0x467   :  { %v1088_v28 = vmul.f32 %v1545_v27, %v1537_v13 }
 0x469   :  { %1437 = vmatmul.mubr.msk.f32.vlgmr.msra.gmra.mrb[8].mxu0 %vm767_vm10, %v778_v25 }
 0x46a   :  { %1445 = vmatpush3.msra.mxu0 %v1767_v42  ;;  %1446 = vmatprep.mubr.msk.f32.mxu0 %vm1649_vm3, %v1647_v2  ;;  %v1547_v29 = vpop.eup %1546 }
 0x46b   :  { %1454 = vmatprep.subr.mxu0 %v1647_v2  ;;  %v1244_v30 = vmul.f32 %v1547_v29, %v1539_v17 }
 0x471   :  { %1447 = vmatmul.mubr.msk.f32.vlgmr.msra.gmra.mrb[8].mxu0 %vm767_vm10, %v1088_v28 }
 0x472   :  { %1455 = vmatpush3.msra.mxu0 %v1769_v44  ;;  %1456 = vmatprep.mubr.msk.f32.mxu0 %vm1649_vm3, %v1647_v2 }
 0x479   :  { %1457 = vmatmul.mubr.msk.f32.vlgmr.msra.gmra.mrb[8].mxu0 %vm767_vm10, %v1244_v30 }
 0x47a   :  { %1581 = shalt.err (!%p1578_p12)
}
 0x47b   :  { %s1582_s11 = scalar_lea.hbm %s1861_s7, 128 }
 0x47c   :  { %p1583_p13 = scmp.ne.s32.totalorder %s1861_s7, %s1582_s11  ;;  %p1586_p0 = scmp.lt.u32.totalorder %s1582_s11, %s1861_s7 }
 0x47e   :  { %p1588_p1 = pnand %p1586_p0, %p1583_p13 }
 0x480   :  { %1591 = shalt.err (!%p1588_p1)
}
 0x481   :  { %1345 = dma.vmem_to_hbm [thread:$0]  %s1343_s27, 128, %s1861_s7, [#allocation7]   ;;  %1321 = vst.msk [vmem:[#allocation5] sm:$0x1] %vm1320_vm11, %v1319_v31  ;;  %vm1322_vm12 = vcmask 260096   ;;  %vm1324_vm13 = vcmask 261127  }
 0x482   :  { %s1651_s17 = smov [#allocation5]   ;;  %s1652_s19 = smov [#allocation8]  }
 0x483   :  { %s1332_s18 = sshll.u32 %s1651_s17, 4  ;;  %s1352_s20 = sshll.u32 %s1652_s19, 4  ;;  %s1333_s18 = int_to_ptr.vmem [resolvable:$true] %s1332_s18  ;;  %s1822_s20 = int_to_ptr.vmem [resolvable:$true] %s1352_s20 }
 0x484   :  { %s1592_s21 = scalar_lea.vmem %s1333_s18, 128  ;;  %p1597_p3 = scmp.lt.s32.totalorder %s1333_s18, %s1333_s18 }
 0x485   :  { %p1593_p2 = scmp.ne.s32.totalorder %s1333_s18, %s1592_s21  ;;  %p1598_p4 = scmp.lt.s32.totalorder %s1592_s21, %s1592_s21 }
 0x487   :  { %p1599_p5 = por %p1598_p4, %p1597_p3 }
 0x489   :  { %p1600_p6 = pnand %p1599_p5, %p1593_p2 }
 0x54c   :  { %v1314_v2 = vpop.f32.mrb[8].mxu0 }
 0x54d   :  { %1323 = vst.msk [vmem:[#allocation5 + $0x1] sm:$0x7f] %vm1322_vm12, %v1314_v2  ;;  %v1458_v32 = vpop.f32.mrb[9].mxu0 }
 0x54e   :  { %1325 = vst.msk [vmem:[#allocation8 - $0x7] sm:$0x80] %vm1324_vm13, %v1314_v2 }
 0x54f   :  { %1603 = shalt.err (!%p1600_p6)
}
 0x550   :  { %s1604_s4 = scalar_lea.hbm %s1860_s6, 128 }
 0x551   :  { %p1605_p7 = scmp.ne.s32.totalorder %s1860_s6, %s1604_s4  ;;  %p1608_p8 = scmp.lt.u32.totalorder %s1604_s4, %s1860_s6 }
 0x553   :  { %p1610_p9 = pnand %p1608_p8, %p1605_p7 }
 0x555   :  { %1613 = shalt.err (!%p1610_p9)
}
 0x556   :  { %1335 = dma.vmem_to_hbm [thread:$0]  %s1333_s18, 128, %s1860_s6, [#allocation4]  }
 0x557   :  { %s1614_s26 = scalar_lea.vmem %s1822_s20, 16  ;;  %s1618_s2 = scalar_lea.vmem %s1822_s20, 32 }
 0x558   :  { %p1615_p10 = scmp.ne.s32.totalorder %s1822_s20, %s1614_s26  ;;  %p1619_p11 = scmp.lt.s32.totalorder %s1822_s20, %s1822_s20 }
 0x559   :  { %p1620_p12 = scmp.lt.s32.totalorder %s1618_s2, %s1614_s26 }
 0x55b   :  { %p1621_p13 = por %p1620_p12, %p1619_p11 }
 0x55d   :  { %p1622_p0 = pnand %p1621_p13, %p1615_p10 }
 0x55f   :  { %1625 = shalt.err (!%p1622_p0)
}
 0x560   :  { %s1626_s29 = scalar_lea.hbm %s1862_s8, 16 }
 0x561   :  { %p1627_p1 = scmp.ne.s32.totalorder %s1862_s8, %s1626_s29  ;;  %p1630_p2 = scmp.lt.u32.totalorder %s1626_s29, %s1862_s8 }
 0x563   :  { %p1632_p3 = pnand %p1630_p2, %p1627_p1 }
 0x565   :  { %1635 = shalt.err (!%p1632_p3)
}
 0x566   :  { %1355 = dma.vmem_to_hbm [thread:$0]  %s1822_s20, 16, %s1862_s8, [#allocation7]  }
 0x567   :  { %1638 = dma.done.wait [#allocation4], 128  }
 0x568   :  { %1639 = vsyncadd [#allocation4], 4294967168 }
 0x569   :  { %1640 = dma.done.wait [#allocation7], 144  }
 0x56a   :  { %1641 = vsyncadd [#allocation7], 4294967152 }
 0x56b   :  { %1365 = vsyncpa [#allocation3], 1 }
 0x56c   :  { %1366 = vsyncpa [#allocation4], 1 }
 0x56d   :  { %1367 = vsyncpa [#allocation7], 1 }

</bundles_post_ra>
